<compile_context>
chip_gen: v7x
topology: tpu7x:2x2x1
jax: 0.10.0
libtpu: 0.0.40
codegen_flags: <defaults>
</compile_context>

<pallas_src>
import jax
import jax.numpy as jnp
from jax import lax
from jax.experimental import pallas as pl
from jax.experimental.pallas import tpu as pltpu


def _round_up(v, m):
    return ((v + m - 1) // m) * m


def _concat_linear_kernel(t_ref, x_ref, w_ref, wt_ref, b_ref, o_ref, acc_ref):
    """One (i, j, k) grid step of y = [t | x] @ W^T + b.

    t_ref  : (tm, 1)  time column for this batch tile
    x_ref  : (tm, tk) feature tile
    w_ref  : (tn, tk) weight tile, PyTorch (out, in) layout (no transpose)
    wt_ref : (1, tn)  first weight column (time weights)
    b_ref  : (1, tn)  bias row
    o_ref  : (tm, tn) output tile
    acc_ref: (tm, tn) f32 accumulator scratch, resident across the K axis
    """
    k = pl.program_id(2)

    @pl.when(k == 0)
    def _():
        acc_ref[...] = jnp.zeros_like(acc_ref)

    # MXU: x_tile @ w_tile.T (contract on shared K axis, PyTorch layout).
    acc_ref[...] += lax.dot_general(
        x_ref[...], w_ref[...],
        dimension_numbers=(((1,), (1,)), ((), ())),
        preferred_element_type=jnp.float32)

    @pl.when(k == pl.num_programs(2) - 1)
    def _():
        # Rank-1 time term + bias run on the VPU in the epilogue; this replaces
        # the PyTorch concat of a time column (and the misaligned K+1 axis).
        out = acc_ref[...] + t_ref[...] * wt_ref[...] + b_ref[...]
        o_ref[...] = out.astype(o_ref.dtype)


def concat_linear(t, x, weight, bias, *, tm=256, tn=256, tk=512):
    """Pallas implementation of ConcatLinear.forward.

    Args:
      t:      (B,) float32 time values.
      x:      (B, dim_in) float32 features.
      weight: (dim_out, dim_in + 1) float32 (PyTorch Linear layout).
      bias:   (dim_out,) float32.
      tm/tn/tk: tile sizes (clamped + aligned to the (8,128) vreg geometry).

    Returns:
      (B, dim_out) float32.
    """
    B, dim_in = x.shape
    dim_out = weight.shape[0]
    out_dtype = x.dtype

    # Clamp tiles to (aligned) problem size; keep multiples of (8, 128).
    tm = min(tm, _round_up(B, 8))
    tn = min(tn, _round_up(dim_out, 128))
    tk = min(tk, _round_up(dim_in, 128))

    B_pad = _round_up(B, tm)
    N_pad = _round_up(dim_out, tn)
    K_pad = _round_up(dim_in, tk)

    # Split the weight: column 0 is the time weight, the rest multiplies x.
    # (In a real model these would be stored pre-split to avoid the slice.)
    w_x = weight[:, 1:]                       # (dim_out, dim_in), PyTorch layout
    w_t = weight[:, 0]                        # (dim_out,)

    # Zero-pad to tile multiples (zero K-padding of x and w_x is exact).
    x_p = jnp.pad(x, ((0, B_pad - B), (0, K_pad - dim_in)))
    w_p = jnp.pad(w_x, ((0, N_pad - dim_out), (0, K_pad - dim_in)))
    t_col = jnp.pad(t.astype(out_dtype)[:, None], ((0, B_pad - B), (0, 0)))
    wt_row = jnp.pad(w_t[None, :], ((0, 0), (0, N_pad - dim_out)))
    b_row = jnp.pad(bias[None, :], ((0, 0), (0, N_pad - dim_out)))

    grid = (B_pad // tm, N_pad // tn, K_pad // tk)

    flops = 2 * B_pad * K_pad * N_pad + 3 * B_pad * N_pad
    bytes_accessed = 4 * (B_pad * K_pad + N_pad * K_pad + B_pad * N_pad
                          + 2 * N_pad + B_pad)

    out = pl.pallas_call(
        _concat_linear_kernel,
        out_shape=jax.ShapeDtypeStruct((B_pad, N_pad), out_dtype),
        grid_spec=pltpu.PrefetchScalarGridSpec(
            num_scalar_prefetch=0,
            grid=grid,
            in_specs=[
                pl.BlockSpec((tm, 1), lambda i, j, k: (i, 0)),    # t column
                pl.BlockSpec((tm, tk), lambda i, j, k: (i, k)),   # x tile
                pl.BlockSpec((tn, tk), lambda i, j, k: (j, k)),   # weight tile
                pl.BlockSpec((1, tn), lambda i, j, k: (0, j)),    # time weights
                pl.BlockSpec((1, tn), lambda i, j, k: (0, j)),    # bias
            ],
            out_specs=pl.BlockSpec((tm, tn), lambda i, j, k: (i, j)),
            scratch_shapes=[pltpu.VMEM((tm, tn), jnp.float32)],
        ),
        compiler_params=pltpu.CompilerParams(
            dimension_semantics=("parallel", "parallel", "arbitrary"),
            vmem_limit_bytes=32 * 1024 * 1024,
        ),
        cost_estimate=pl.CostEstimate(
            flops=flops, transcendentals=0, bytes_accessed=bytes_accessed),
    )(t_col, x_p, w_p, wt_row, b_row)

    return out[:B, :dim_out]
    # TODO(synk): optionally cast x / w_x to bf16 before the call (keep the f32
    # accumulator) on v6e/v7x when model precision allows.


def init_params(key, dim_in, dim_out):
    """Deterministic init mimicking nn.Linear defaults (uniform +/- 1/sqrt(fan_in))."""
    fan_in = dim_in + 1
    bound = 1.0 / (fan_in ** 0.5)
    k_w, k_b = jax.random.split(key)
    weight = jax.random.uniform(
        k_w, (dim_out, fan_in), jnp.float32, minval=-bound, maxval=bound)
    bias = jax.random.uniform(
        k_b, (dim_out,), jnp.float32, minval=-bound, maxval=bound)
    return weight, bias


def _reference(t, x, weight, bias):
    tt = t[:, None] * jnp.ones_like(x[:, :1])
    ttx = jnp.concatenate([tt, x], axis=1)
    return jnp.dot(ttx, weight.T, precision=lax.Precision.HIGHEST) + bias


if __name__ == "__main__":
    key = jax.random.PRNGKey(0)

    # --- Small shapes consistent with the module's forward ---------------
    B, dim_in, dim_out = 8, 16, 32
    k_t, k_x, k_p, key = jax.random.split(key, 4)
    t = jax.random.normal(k_t, (B,), jnp.float32)
    x = jax.random.normal(k_x, (B, dim_in), jnp.float32)
    weight, bias = init_params(k_p, dim_in, dim_out)

    y = concat_linear(t, x, weight, bias)
    jax.block_until_ready(y)
    y_ref = _reference(t, x, weight, bias)
    assert y.shape == (B, dim_out)
    assert jnp.allclose(y, y_ref, atol=1e-4, rtol=1e-4)

    # --- Larger shapes to exercise the multi-tile grid + K accumulation --
    B2, din2, dout2 = 256, 256, 256
    k_t, k_x, k_p = jax.random.split(key, 3)
    t2 = jax.random.normal(k_t, (B2,), jnp.float32)
    x2 = jax.random.normal(k_x, (B2, din2), jnp.float32)
    w2, b2 = init_params(k_p, din2, dout2)

    y2 = concat_linear(t2, x2, w2, b2, tm=128, tn=128, tk=128)  # grid (2,2,2)
    jax.block_until_ready(y2)
    y2_ref = _reference(t2, x2, w2, b2)
    assert y2.shape == (B2, dout2)
    assert jnp.allclose(y2, y2_ref, atol=2e-3, rtol=2e-3)

    print("KERNEL_OK")
</pallas_src>

<mosaic_0001>
module attributes {stable_mosaic.version = 11 : i64} {
  func.func @_concat_linear_kernel(%arg0: i32, %arg1: i32, %arg2: i32, %arg3: memref<8x1xf32, #tpu.memory_space<vmem>>, %arg4: memref<8x128xf32, #tpu.memory_space<vmem>>, %arg5: memref<128x128xf32, #tpu.memory_space<vmem>>, %arg6: memref<1x128xf32, #tpu.memory_space<vmem>>, %arg7: memref<1x128xf32, #tpu.memory_space<vmem>>, %arg8: memref<8x128xf32, #tpu.memory_space<vmem>>, %arg9: memref<8x128xf32, #tpu.memory_space<vmem>>) attributes {dimension_semantics = [#tpu.dimension_semantics<parallel>, #tpu.dimension_semantics<parallel>, #tpu.dimension_semantics<arbitrary>], iteration_bounds = array<i64: 1, 1, 1>, scalar_prefetch = 0 : i64, scratch_operands = 1 : i64, tpu.core_type = #tpu.core_type<tc>, window_params = [{transform_indices = @transform_0, window_bounds = array<i64: 8, 1>}, {transform_indices = @transform_1, window_bounds = array<i64: 8, 128>}, {transform_indices = @transform_2, window_bounds = array<i64: 128, 128>}, {transform_indices = @transform_3, window_bounds = array<i64: 1, 128>}, {transform_indices = @transform_4, window_bounds = array<i64: 1, 128>}, {transform_indices = @transform_5, window_bounds = array<i64: 8, 128>}]} {
    %c0_i32 = arith.constant 0 : i32
    %0 = arith.cmpi eq, %arg2, %c0_i32 : i32
    %1 = arith.extui %0 : i1 to i32
    %c0_i32_0 = arith.constant 0 : i32
    %2 = arith.cmpi ne, %1, %c0_i32_0 : i32
    scf.if %2 {
      %cst_10 = arith.constant 0.000000e+00 : f32
      %12 = vector.broadcast %cst_10 : f32 to vector<8x128xf32>
      %c0_11 = arith.constant 0 : index
      %c0_12 = arith.constant 0 : index
      %13 = vector.load %arg9[%c0_11, %c0_12] : memref<8x128xf32, #tpu.memory_space<vmem>>, vector<8x128xf32>
      tpu.vector_store %arg9[%c0_11, %c0_12], %12 {strides = array<i32>} : memref<8x128xf32, #tpu.memory_space<vmem>>, vector<8x128xf32>,
    } else {
    }
    %c0 = arith.constant 0 : index
    %c0_1 = arith.constant 0 : index
    %3 = vector.load %arg9[%c0, %c0_1] : memref<8x128xf32, #tpu.memory_space<vmem>>, vector<8x128xf32>
    %c0_2 = arith.constant 0 : index
    %c0_3 = arith.constant 0 : index
    %4 = vector.load %arg4[%c0_2, %c0_3] : memref<8x128xf32, #tpu.memory_space<vmem>>, vector<8x128xf32>
    %c0_4 = arith.constant 0 : index
    %c0_5 = arith.constant 0 : index
    %5 = vector.load %arg5[%c0_4, %c0_5] : memref<128x128xf32, #tpu.memory_space<vmem>>, vector<128x128xf32>
    %cst = arith.constant dense<0.000000e+00> : vector<8x128xf32>
    %6 = tpu.matmul %4, %5, %cst {dimension_numbers = #tpu.dot_dimension_numbers<[1], [1], [0], [0], [0, 0, 1, 0], [], []>} : vector<8x128xf32>, vector<128x128xf32>, vector<8x128xf32> -> vector<8x128xf32>
    %7 = arith.addf %3, %6 : vector<8x128xf32>
    %c0_6 = arith.constant 0 : index
    %c0_7 = arith.constant 0 : index
    %8 = vector.load %arg9[%c0_6, %c0_7] : memref<8x128xf32, #tpu.memory_space<vmem>>, vector<8x128xf32>
    tpu.vector_store %arg9[%c0_6, %c0_7], %7 {strides = array<i32>} : memref<8x128xf32, #tpu.memory_space<vmem>>, vector<8x128xf32>,
    %c0_i32_8 = arith.constant 0 : i32
    %9 = arith.cmpi eq, %arg2, %c0_i32_8 : i32
    %10 = arith.extui %9 : i1 to i32
    %c0_i32_9 = arith.constant 0 : i32
    %11 = arith.cmpi ne, %10, %c0_i32_9 : i32
    scf.if %11 {
      %c0_10 = arith.constant 0 : index
      %c0_11 = arith.constant 0 : index
      %12 = vector.load %arg9[%c0_10, %c0_11] : memref<8x128xf32, #tpu.memory_space<vmem>>, vector<8x128xf32>
      %c0_12 = arith.constant 0 : index
      %c0_13 = arith.constant 0 : index
      %13 = vector.load %arg3[%c0_12, %c0_13] : memref<8x1xf32, #tpu.memory_space<vmem>>, vector<8x1xf32>
      %c0_14 = arith.constant 0 : index
      %c0_15 = arith.constant 0 : index
      %14 = vector.load %arg6[%c0_14, %c0_15] : memref<1x128xf32, #tpu.memory_space<vmem>>, vector<1x128xf32>
      %15 = vector.broadcast %13 : vector<8x1xf32> to vector<8x128xf32>
      %16 = vector.broadcast %14 : vector<1x128xf32> to vector<8x128xf32>
      %17 = arith.mulf %15, %16 : vector<8x128xf32>
      %18 = arith.addf %12, %17 : vector<8x128xf32>
      %c0_16 = arith.constant 0 : index
      %c0_17 = arith.constant 0 : index
      %19 = vector.load %arg7[%c0_16, %c0_17] : memref<1x128xf32, #tpu.memory_space<vmem>>, vector<1x128xf32>
      %20 = vector.broadcast %19 : vector<1x128xf32> to vector<8x128xf32>
      %21 = arith.addf %18, %20 : vector<8x128xf32>
      %c0_18 = arith.constant 0 : index
      %c0_19 = arith.constant 0 : index
      %22 = vector.load %arg8[%c0_18, %c0_19] : memref<8x128xf32, #tpu.memory_space<vmem>>, vector<8x128xf32>
      tpu.vector_store %arg8[%c0_18, %c0_19], %21 {strides = array<i32>} : memref<8x128xf32, #tpu.memory_space<vmem>>, vector<8x128xf32>,
    } else {
    }
    return
  }
  func.func @transform_0(%arg0: i32, %arg1: i32, %arg2: i32) -> (i32, i32) {
    %c0_i32 = arith.constant 0 : i32
    %c0_i32_0 = arith.constant 0 : i32
    return %arg0, %c0_i32 : i32, i32
  }
  func.func @transform_1(%arg0: i32, %arg1: i32, %arg2: i32) -> (i32, i32) {
    %c0_i32 = arith.constant 0 : i32
    return %arg0, %arg2 : i32, i32
  }
  func.func @transform_2(%arg0: i32, %arg1: i32, %arg2: i32) -> (i32, i32) {
    %c0_i32 = arith.constant 0 : i32
    return %arg1, %arg2 : i32, i32
  }
  func.func @transform_3(%arg0: i32, %arg1: i32, %arg2: i32) -> (i32, i32) {
    %c0_i32 = arith.constant 0 : i32
    %c0_i32_0 = arith.constant 0 : i32
    return %c0_i32, %arg1 : i32, i32
  }
  func.func @transform_4(%arg0: i32, %arg1: i32, %arg2: i32) -> (i32, i32) {
    %c0_i32 = arith.constant 0 : i32
    %c0_i32_0 = arith.constant 0 : i32
    return %c0_i32, %arg1 : i32, i32
  }
  func.func @transform_5(%arg0: i32, %arg1: i32, %arg2: i32) -> (i32, i32) {
    %c0_i32 = arith.constant 0 : i32
    return %arg0, %arg1 : i32, i32
  }
}

</mosaic_0001>

<bundles_post_ra>
// kernel: tpu_custom_call.1
= control target key start
LH: loop header
LB: loop body
LE: loop exit
PB: predicated region body
PF: predicated region fallthrough
CT: control target
= control target key end

     0   :  { %10 = vsyncpa [#allocation4], 0  ;;  %s382_s0 = inlined_call_operand.vmem [shape: f32[8,1], index: 0, kind: input, shape index: {}]   ;;  %s383_s1 = inlined_call_operand.vmem [shape: f32[8,128], index: 1, kind: input, shape index: {}]   ;;  %s384_s2 = inlined_call_operand.hbm [shape: f32[128,128], index: 2, kind: input, shape index: {}]   ;;  %s385_s3 = inlined_call_operand.vmem [shape: f32[1,128], index: 3, kind: input, shape index: {}]   ;;  %s386_s4 = inlined_call_operand.vmem [shape: f32[1,128], index: 4, kind: input, shape index: {}]   ;;  %s387_s5 = inlined_call_operand.hbm [shape: f32[8,128], index: 5, kind: output, shape index: {}]  }
   0x1   :  { %11 = vsyncpa [#allocation5], 0  ;;  %s308_s18 = smov [#allocation3]   ;;  %s260_s22 = scalar_lea.hbm %s384_s2, 2048 }
   0x2   :  { %s21_s19 = sshll.u32 %s308_s18, 4  ;;  %p261_p0 = scmp.ne.s32.totalorder %s384_s2, %s260_s22  ;;  %s22_s19 = int_to_ptr.vmem [resolvable:$true] %s21_s19 }
   0x3   :  { %p264_p1 = scmp.lt.u32.totalorder %s260_s22, %s384_s2 }
   0x5   :  { %p266_p2 = pnand %p264_p1, %p261_p0 }
   0x7   :  { %269 = shalt.err (!%p266_p2)
}
   0x8   :  { %s270_s27 = scalar_lea.vmem %s22_s19, 2048  ;;  %p275_p4 = scmp.lt.s32.totalorder %s22_s19, %s22_s19 }
   0x9   :  { %p271_p3 = scmp.ne.s32.totalorder %s22_s19, %s270_s27  ;;  %p276_p5 = scmp.lt.s32.totalorder %s270_s27, %s270_s27 }
   0xb   :  { %p277_p6 = por %p276_p5, %p275_p4 }
   0xd   :  { %p278_p7 = pnand %p277_p6, %p271_p3 }
   0xf   :  { %281 = shalt.err (!%p278_p7)
}
  0x10   :  { %s309_s28 = smov 128   ;;  %s310_s29 = smov 8  }
  0x11   :  { %27 = dma.hbm_to_vmem [thread:$0]  %s384_s2, 2048, %s22_s19, [#allocation4], %s309_s28, %s309_s28, %s310_s29  }
  0x12   :  { %304 = dma.done.wait [#allocation4], 2048  }
  0x13   :  { %305 = vsyncadd [#allocation4], 4294965248  ;;  %v311_v0 = vmov 0.0|0.0   ;;  %vm312_vm0 = vmmov 0   ;;  %v313_v1 = vmov 0.0   ;;  %v314_v2 = vmov 0  }
  0x14   :  { %227 = vmatprep.subr.bf16.mxu0 %v311_v0  ;;  %224 = vmatprep.mubr.msk.f32.mxu0 %vm312_vm0, %v313_v1  ;;  %v42_v3 = vld [vmem:[#allocation3] sm:$0xff]  ;;  %v43_v4 = vld [vmem:[#allocation3 + $0x8] sm:$0xff]  ;;  %v44_v6 = vld [vmem:[#allocation3 + $0x10] sm:$0xff]  ;;  %s315_s13 = smov [#allocation6]  }
  0x15   :  { %259 = vset.pattern.permute.xlu0 %v314_v2  ;;  %v228_v5 = vpack.c.bf16 %v43_v4, %v42_v3  ;;  %v45_v7 = vld [vmem:[#allocation3 + $0x18] sm:$0xff]  ;;  %v46_v10 = vld [vmem:[#allocation3 + $0x20] sm:$0xff]  ;;  %v47_v11 = vld [vmem:[#allocation3 + $0x28] sm:$0xff]  ;;  %s164_s14 = sshll.u32 %s315_s13, 4  ;;  %s165_s14 = int_to_ptr.vmem [resolvable:$true] %s164_s14 }
  0x16   :  { %v134_v8 = vld [vmem:[%s382_s0] sm:$0xff]  ;;  %v231_v9 = vpack.c.bf16 %v45_v7, %v44_v6  ;;  %v234_v12 = vpack.c.bf16 %v47_v11, %v46_v10  ;;  %v48_v13 = vld [vmem:[#allocation3 + $0x30] sm:$0xff]  ;;  %v50_v16 = vld [vmem:[#allocation3 + $0x40] sm:$0xff]  ;;  %p287_p9 = scmp.lt.s32.totalorder %s165_s14, %s165_s14 }
  0x17   :  { %229 = vmatpush3.bf16.xpose.msra.mxu0 %v228_v5  ;;  %138 = vperm.xlu0 %259, %v134_v8   ;;  %v49_v14 = vld [vmem:[#allocation3 + $0x38] sm:$0xff]  ;;  %v51_v17 = vld [vmem:[#allocation3 + $0x48] sm:$0xff]  ;;  %v52_v19 = vld [vmem:[#allocation3 + $0x50] sm:$0xff] }
  0x18   :  { %230 = vmatprep.subr.bf16.mxu0 %v311_v0  ;;  %v237_v15 = vpack.c.bf16 %v49_v14, %v48_v13  ;;  %v240_v18 = vpack.c.bf16 %v51_v17, %v50_v16  ;;  %v53_v20 = vld [vmem:[#allocation3 + $0x58] sm:$0xff]  ;;  %v54_v22 = vld [vmem:[#allocation3 + $0x60] sm:$0xff]  ;;  %v55_v23 = vld [vmem:[#allocation3 + $0x68] sm:$0xff] }
  0x19   :  { %v243_v21 = vpack.c.bf16 %v53_v20, %v52_v19  ;;  %v246_v24 = vpack.c.bf16 %v55_v23, %v54_v22  ;;  %v56_v25 = vld [vmem:[#allocation3 + $0x70] sm:$0xff]  ;;  %v57_v26 = vld [vmem:[#allocation3 + $0x78] sm:$0xff] }
  0x1a   :  { %v249_v27 = vpack.c.bf16 %v57_v26, %v56_v25  ;;  %v41_v28 = vld [vmem:[%s383_s1] sm:$0xff]  ;;  %s282_s1 = scalar_lea.vmem %s165_s14, 128 }
  0x1b   :  { %v173_v29 = vld [vmem:[%s385_s3] ss:$0 sm:$0xff]  ;;  %p283_p8 = scmp.ne.s32.totalorder %s165_s14, %s282_s1  ;;  %p288_p10 = scmp.lt.s32.totalorder %s282_s1, %s282_s1 }
  0x1c   :  { %v174_v33 = vld [vmem:[%s386_s4] ss:$0 sm:$0xff] }
  0x1d   :  { %p289_p11 = por %p288_p10, %p287_p9 }
  0x1f   :  { %232 = vmatpush3.bf16.xpose.msra.mxu0 %v231_v9  ;;  %p290_p12 = pnand %p289_p11, %p283_p8 }
  0x20   :  { %233 = vmatprep.subr.bf16.mxu0 %v311_v0 }
  0x27   :  { %235 = vmatpush3.bf16.xpose.msra.mxu0 %v234_v12 }
  0x28   :  { %236 = vmatprep.subr.bf16.mxu0 %v311_v0 }
  0x2f   :  { %238 = vmatpush3.bf16.xpose.msra.mxu0 %v237_v15 }
  0x30   :  { %239 = vmatprep.subr.bf16.mxu0 %v311_v0 }
  0x37   :  { %241 = vmatpush3.bf16.xpose.msra.mxu0 %v240_v18 }
  0x38   :  { %242 = vmatprep.subr.bf16.mxu0 %v311_v0 }
  0x3f   :  { %244 = vmatpush3.bf16.xpose.msra.mxu0 %v243_v21 }
  0x40   :  { %245 = vmatprep.subr.bf16.mxu0 %v311_v0 }
  0x47   :  { %247 = vmatpush3.bf16.xpose.msra.mxu0 %v246_v24 }
  0x48   :  { %248 = vmatprep.subr.bf16.mxu0 %v311_v0 }
  0x4f   :  { %250 = vmatpush3.bf16.xpose.msra.mxu0 %v249_v27 }
  0x56   :  { %225 = vmatmul.mubr.f32.vlgmr.msra.gmra.mrb[0].mxu0 %v41_v28 }
  0x96   :  { %v139_v30 = vpop.permute.xlu0 %138 }
  0x97   :  { %v147_v31 = vmul.f32 %v173_v29, %v139_v30 }
 0x129   :  { %v124_v32 = vpop.f32.mrb[0].mxu0 }
 0x12a   :  { %v148_v34 = vadd.f32 %v147_v31, %v124_v32  ;;  %v226_v35 = vpop.f32.mrb[1].mxu0 }
 0x12c   :  { %v156_v36 = vadd.f32 %v174_v33, %v148_v34 }
 0x12e   :  { %157 = vst [vmem:[#allocation6] sm:$0xff] %v156_v36 }
 0x12f   :  { %293 = shalt.err (!%p290_p12)
}
 0x130   :  { %s294_s16 = scalar_lea.hbm %s387_s5, 128 }
 0x131   :  { %p295_p13 = scmp.ne.s32.totalorder %s387_s5, %s294_s16  ;;  %p298_p0 = scmp.lt.u32.totalorder %s294_s16, %s387_s5 }
 0x133   :  { %p300_p1 = pnand %p298_p0, %p295_p13 }
 0x135   :  { %303 = shalt.err (!%p300_p1)
}
 0x136   :  { %167 = dma.vmem_to_hbm [thread:$0]  %s165_s14, 128, %s387_s5, [#allocation5]  }
 0x137   :  { %306 = dma.done.wait [#allocation5], 128  }
 0x138   :  { %307 = vsyncadd [#allocation5], 4294967168 }
 0x139   :  { %171 = vsyncpa [#allocation4], 1 }
 0x13a   :  { %172 = vsyncpa [#allocation5], 1 }

</bundles_post_ra>
